<compile_context>
chip_gen: v6e
topology: v6e:2x2x1
jax: 0.10.0
libtpu: 0.0.40
codegen_flags: <defaults>
</compile_context>

<pallas_src>
import jax
import jax.numpy as jnp
from jax.experimental import pallas as pl
from jax.experimental.pallas import tpu as pltpu


def _round_up(x, m):
    return (x + m - 1) // m * m


def _pick_tile(n):
    # 512-tiles reach ~85% of the HBM roofline (vs ~63% at 256); keep at least
    # two row tiles when possible so the "parallel" axis splits across v7x TCs.
    if n >= 2048:
        return 512
    if n >= 512:
        return 256
    return 128


# --------------------------- stage 1: XW = X @ W ---------------------------

def _xw_kernel(x_ref, w_ref, o_ref):
    o_ref[...] = jnp.dot(x_ref[...], w_ref[...],
                         preferred_element_type=jnp.float32).astype(o_ref.dtype)


def _xw_matmul(x_bf, w_bf, *, tm):
    """x: [Np, Cin_p] bf16, w: [Cin_p, Cout_p] bf16 -> [Np, Cout_p] bf16."""
    n, cin = x_bf.shape
    cout = w_bf.shape[1]
    return pl.pallas_call(
        _xw_kernel,
        out_shape=jax.ShapeDtypeStruct((n, cout), jnp.bfloat16),
        grid=(n // tm,),
        in_specs=[
            pl.BlockSpec((tm, cin), lambda i: (i, 0)),
            pl.BlockSpec((cin, cout), lambda i: (0, 0)),   # resident weights
        ],
        out_specs=pl.BlockSpec((tm, cout), lambda i: (i, 0)),
        compiler_params=pltpu.CompilerParams(
            dimension_semantics=("parallel",),
            vmem_limit_bytes=32 * 1024 * 1024,   # v5e default is only 16 MiB
        ),
    )(x_bf, w_bf)


# ------------------- stage 2: H = relu(A_hat @ XW + b) ---------------------

def _make_agg_kernel(tk, xw_resident, out_is_f32):
    """Build an aggregation kernel.

    xw_resident: XW block is the full [Np, Cout_p] array; slice the k-chunk
                 in-kernel (HBM read of XW happens once, not per row tile).
    out_is_f32:  accumulate directly into the (VMEM-resident) output block,
                 no scratch; otherwise use an f32 scratch and cast at the end.
    """

    def xw_tile(xw_ref, k):
        if xw_resident:
            start = pl.multiple_of(k * tk, tk)
            return xw_ref[pl.ds(start, tk), :]
        return xw_ref[...]

    if out_is_f32:
        def kernel(a_ref, xw_ref, b_ref, o_ref):
            k = pl.program_id(1)

            @pl.when(k == 0)
            def _():
                o_ref[...] = jnp.zeros_like(o_ref)

            o_ref[...] += jnp.dot(a_ref[...], xw_tile(xw_ref, k),
                                  preferred_element_type=jnp.float32)

            @pl.when(k == pl.num_programs(1) - 1)
            def _():
                # fused bias + ReLU in the finalize branch (VPU work under MXU)
                o_ref[...] = jnp.maximum(o_ref[...] + b_ref[...], 0.0)
        return kernel

    def kernel(a_ref, xw_ref, b_ref, o_ref, acc_ref):
        k = pl.program_id(1)

        @pl.when(k == 0)
        def _():
            acc_ref[...] = jnp.zeros_like(acc_ref)

        acc_ref[...] += jnp.dot(a_ref[...], xw_tile(xw_ref, k),
                                preferred_element_type=jnp.float32)

        @pl.when(k == pl.num_programs(1) - 1)
        def _():
            o_ref[...] = jnp.maximum(acc_ref[...] + b_ref[...],
                                     0.0).astype(o_ref.dtype)
    return kernel


def _aggregate(a_bf, xw_bf, b, *, tm, tk, out_dtype):
    """a: [Np, Np] bf16, xw: [Np, Cout_p] bf16, b: [1, Cout_p] f32."""
    n = a_bf.shape[0]
    cout = xw_bf.shape[1]
    out_is_f32 = out_dtype == jnp.float32
    out_bytes = 4 if out_is_f32 else 2

    # Resident XW: read once from HBM (2 double-buffered copies in VMEM).
    # Fall back to k-streamed tiles only if the resident footprint would be big.
    xw_resident = 2 * n * cout * 2 <= 8 * 1024 * 1024
    if xw_resident:
        xw_spec = pl.BlockSpec((n, cout), lambda i, k: (0, 0))
        xw_bytes = n * cout * 2
    else:
        xw_spec = pl.BlockSpec((tk, cout), lambda i, k: (k, 0))
        xw_bytes = (n // tm) * n * cout * 2

    kernel = _make_agg_kernel(tk, xw_resident, out_is_f32)
    scratch = [] if out_is_f32 else [pltpu.VMEM((tm, cout), jnp.float32)]

    cost = pl.CostEstimate(
        flops=2 * n * n * cout,
        transcendentals=0,
        bytes_accessed=n * n * 2 + xw_bytes + n * cout * out_bytes + cout * 4,
    )
    return pl.pallas_call(
        kernel,
        out_shape=jax.ShapeDtypeStruct((n, cout), out_dtype),
        grid=(n // tm, n // tk),                               # reduction axis last
        in_specs=[
            pl.BlockSpec((tm, tk), lambda i, k: (i, k)),       # A_hat tile
            xw_spec,                                           # resident XW
            pl.BlockSpec((1, cout), lambda i, k: (0, 0)),      # resident bias
        ],
        out_specs=pl.BlockSpec((tm, cout), lambda i, k: (i, 0)),
        scratch_shapes=scratch,
        compiler_params=pltpu.CompilerParams(
            dimension_semantics=("parallel", "arbitrary"),
            vmem_limit_bytes=32 * 1024 * 1024,
        ),
        cost_estimate=cost,
    )(a_bf, xw_bf, b)


# ------------------------------ module wrapper ------------------------------

def make_double_gcn_conv(a_hat, w1, b1, w2, b2, *, tile=None):
    """Prepare (pad + bf16-cast) the graph and weights ONCE; returns a jitted
    forward(x) computing relu(GCN2(relu(GCN1(x)))) -> [N, Cout] f32."""
    n = a_hat.shape[0]
    cin, cout = w1.shape
    if tile is None:
        tile = _pick_tile(n)
    np_ = _round_up(n, tile)
    cin_p = _round_up(cin, 128)     # lane-dense feature dims
    cout_p = _round_up(cout, 128)

    # Hoisted prep (no per-call N^2 pad + cast traffic). Zero padding keeps the
    # real outputs exact: padded A columns/rows and W rows/cols are zero.
    a_bf = jnp.zeros((np_, np_), jnp.bfloat16).at[:n, :n].set(
        a_hat.astype(jnp.bfloat16))
    w1_bf = jnp.zeros((cin_p, cout_p), jnp.bfloat16).at[:cin, :cout].set(
        w1.astype(jnp.bfloat16))
    w2_bf = jnp.zeros((cout_p, cout_p), jnp.bfloat16).at[:cout, :cout].set(
        w2.astype(jnp.bfloat16))
    b1p = jnp.zeros((1, cout_p), jnp.float32).at[:, :cout].set(b1)
    b2p = jnp.zeros((1, cout_p), jnp.float32).at[:, :cout].set(b2)

    @jax.jit
    def forward(x):
        xp = jnp.zeros((np_, cin_p), jnp.bfloat16).at[:n, :cin].set(
            x.astype(jnp.bfloat16))
        # Layer 1: bf16 intermediate halves the h1 HBM write + layer-2 read.
        xw1 = _xw_matmul(xp, w1_bf, tm=tile)
        h1 = _aggregate(a_bf, xw1, b1p, tm=tile, tk=tile, out_dtype=jnp.bfloat16)
        # NOTE: padded rows of h1 equal relu(b1); harmless since A_hat's padded
        # columns are zero, so they never reach real output rows.
        # Layer 2: f32 output, accumulate directly in the output block.
        xw2 = _xw_matmul(h1, w2_bf, tm=tile)
        h2 = _aggregate(a_bf, xw2, b2p, tm=tile, tk=tile, out_dtype=jnp.float32)
        return h2[:n, :cout]

    return forward


def gcn_normalized_adjacency(edge_index, num_nodes):
    """Dense D^{-1/2}(A+I)D^{-1/2}, PyG gcn_norm convention (edge j->i, agg at i)."""
    src, dst = edge_index[0], edge_index[1]
    adj = jnp.zeros((num_nodes, num_nodes), jnp.float32).at[dst, src].set(1.0)
    adj = adj + jnp.eye(num_nodes, dtype=jnp.float32)          # self-loops
    deg = adj.sum(axis=1)
    dinv = jnp.where(deg > 0, 1.0 / jnp.sqrt(deg), 0.0)
    return dinv[:, None] * adj * dinv[None, :]


if __name__ == "__main__":
    N, C_IN, C_OUT = 16, 8, 32

    # Deterministic graph: bidirectional ring -> 2N directed edges.
    idx = jnp.arange(N, dtype=jnp.int32)
    src = jnp.concatenate([idx, (idx + 1) % N])
    dst = jnp.concatenate([(idx + 1) % N, idx])
    edge_index = jnp.stack([src, dst], axis=0)                  # [2, 2N]

    key = jax.random.PRNGKey(0)
    kx, kw1, kw2, kb1, kb2 = jax.random.split(key, 5)
    x = jax.random.normal(kx, (N, C_IN), jnp.float32)
    w1 = jax.random.normal(kw1, (C_IN, C_OUT), jnp.float32) * (2.0 / (C_IN + C_OUT)) ** 0.5
    w2 = jax.random.normal(kw2, (C_OUT, C_OUT), jnp.float32) * (2.0 / (C_OUT + C_OUT)) ** 0.5
    b1 = jax.random.normal(kb1, (1, C_OUT), jnp.float32) * 0.01
    b2 = jax.random.normal(kb2, (1, C_OUT), jnp.float32) * 0.01

    a_hat = gcn_normalized_adjacency(edge_index, N)

    forward = make_double_gcn_conv(a_hat, w1, b1, w2, b2)
    out = jax.block_until_ready(forward(x))
    assert out.shape == (N, C_OUT)

    # Reference 1: emulate the kernel's bf16 operand path (f32 accumulation).
    f32, bf = jnp.float32, jnp.bfloat16
    a_bf = a_hat.astype(bf)
    xw1_r = jnp.dot(x.astype(bf), w1.astype(bf), preferred_element_type=f32).astype(bf)
    h1_r = jnp.maximum(jnp.dot(a_bf, xw1_r, preferred_element_type=f32) + b1, 0.0).astype(bf)
    xw2_r = jnp.dot(h1_r, w2.astype(bf), preferred_element_type=f32).astype(bf)
    ref_bf = jnp.maximum(jnp.dot(a_bf, xw2_r, preferred_element_type=f32) + b2, 0.0)
    assert jnp.allclose(out, ref_bf, atol=2e-2, rtol=2e-2), "bf16-path reference mismatch"

    # Reference 2: pure f32 math (loose check; bf16 operands bound the error).
    h1_f = jnp.maximum(a_hat @ (x @ w1) + b1, 0.0)
    ref_f32 = jnp.maximum(a_hat @ (h1_f @ w2) + b2, 0.0)
    assert jnp.allclose(out, ref_f32, atol=5e-2, rtol=5e-2), "f32 reference mismatch"

    print("KERNEL_OK")
</pallas_src>

<mosaic_0001>
module attributes {stable_mosaic.version = 11 : i64} {
  func.func @_xw_kernel(%arg0: i32, %arg1: memref<128x128xbf16, #tpu.memory_space<vmem>>, %arg2: memref<128x128xbf16, #tpu.memory_space<vmem>>, %arg3: memref<128x128xbf16, #tpu.memory_space<vmem>>) attributes {dimension_semantics = [#tpu.dimension_semantics<parallel>], iteration_bounds = array<i64: 1>, scalar_prefetch = 0 : i64, scratch_operands = 0 : i64, tpu.core_type = #tpu.core_type<tc>, window_params = [{transform_indices = @transform_0, window_bounds = array<i64: 128, 128>}, {pipeline_mode = #tpu.pipeline_mode<synchronous>, transform_indices = @transform_1, window_bounds = array<i64: 128, 128>}, {transform_indices = @transform_2, window_bounds = array<i64: 128, 128>}]} {
    %c0 = arith.constant 0 : index
    %c0_0 = arith.constant 0 : index
    %0 = vector.load %arg1[%c0, %c0_0] : memref<128x128xbf16, #tpu.memory_space<vmem>>, vector<128x128xbf16>
    %c0_1 = arith.constant 0 : index
    %c0_2 = arith.constant 0 : index
    %1 = vector.load %arg2[%c0_1, %c0_2] : memref<128x128xbf16, #tpu.memory_space<vmem>>, vector<128x128xbf16>
    %cst = arith.constant dense<0.000000e+00> : vector<128x128xf32>
    %2 = tpu.matmul %0, %1, %cst {dimension_numbers = #tpu.dot_dimension_numbers<[1], [0], [0], [1], [0, 0, 1, 1], [], []>} : vector<128x128xbf16>, vector<128x128xbf16>, vector<128x128xf32> -> vector<128x128xf32>
    %3 = arith.truncf %2 : vector<128x128xf32> to vector<128x128xbf16>
    %c0_3 = arith.constant 0 : index
    %c0_4 = arith.constant 0 : index
    %4 = vector.load %arg3[%c0_3, %c0_4] : memref<128x128xbf16, #tpu.memory_space<vmem>>, vector<128x128xbf16>
    tpu.vector_store %arg3[%c0_3, %c0_4], %3 {strides = array<i32>} : memref<128x128xbf16, #tpu.memory_space<vmem>>, vector<128x128xbf16>,
    return
  }
  func.func @transform_0(%arg0: i32) -> (i32, i32) {
    %c0_i32 = arith.constant 0 : i32
    %c0_i32_0 = arith.constant 0 : i32
    return %arg0, %c0_i32 : i32, i32
  }
  func.func @transform_1(%arg0: i32) -> (i32, i32) {
    %c0_i32 = arith.constant 0 : i32
    %c0_i32_0 = arith.constant 0 : i32
    %c0_i32_1 = arith.constant 0 : i32
    return %c0_i32, %c0_i32_0 : i32, i32
  }
  func.func @transform_2(%arg0: i32) -> (i32, i32) {
    %c0_i32 = arith.constant 0 : i32
    %c0_i32_0 = arith.constant 0 : i32
    return %arg0, %c0_i32 : i32, i32
  }
}

module attributes {stable_mosaic.version = 11 : i64} {
  func.func @kernel(%arg0: i32, %arg1: i32, %arg2: memref<128x128xbf16, #tpu.memory_space<vmem>>, %arg3: memref<128x128xbf16, #tpu.memory_space<vmem>>, %arg4: memref<1x128xf32, #tpu.memory_space<vmem>>, %arg5: memref<128x128xbf16, #tpu.memory_space<vmem>>, %arg6: memref<128x128xf32, #tpu.memory_space<vmem>>) attributes {dimension_semantics = [#tpu.dimension_semantics<parallel>, #tpu.dimension_semantics<arbitrary>], iteration_bounds = array<i64: 1, 1>, scalar_prefetch = 0 : i64, scratch_operands = 1 : i64, tpu.core_type = #tpu.core_type<tc>, window_params = [{transform_indices = @transform_0, window_bounds = array<i64: 128, 128>}, {pipeline_mode = #tpu.pipeline_mode<synchronous>, transform_indices = @transform_1, window_bounds = array<i64: 128, 128>}, {pipeline_mode = #tpu.pipeline_mode<synchronous>, transform_indices = @transform_2, window_bounds = array<i64: 1, 128>}, {transform_indices = @transform_3, window_bounds = array<i64: 128, 128>}]} {
    %c0_i32 = arith.constant 0 : i32
    %0 = arith.cmpi eq, %arg1, %c0_i32 : i32
    %1 = arith.extui %0 : i1 to i32
    %c0_i32_0 = arith.constant 0 : i32
    %2 = arith.cmpi ne, %1, %c0_i32_0 : i32
    scf.if %2 {
      %cst_9 = arith.constant 0.000000e+00 : f32
      %15 = vector.broadcast %cst_9 : f32 to vector<128x128xf32>
      %c0_10 = arith.constant 0 : index
      %c0_11 = arith.constant 0 : index
      %16 = vector.load %arg6[%c0_10, %c0_11] : memref<128x128xf32, #tpu.memory_space<vmem>>, vector<128x128xf32>
      tpu.vector_store %arg6[%c0_10, %c0_11], %15 {strides = array<i32>} : memref<128x128xf32, #tpu.memory_space<vmem>>, vector<128x128xf32>,
    } else {
    }
    %c0 = arith.constant 0 : index
    %c0_1 = arith.constant 0 : index
    %3 = vector.load %arg6[%c0, %c0_1] : memref<128x128xf32, #tpu.memory_space<vmem>>, vector<128x128xf32>
    %c0_2 = arith.constant 0 : index
    %c0_3 = arith.constant 0 : index
    %4 = vector.load %arg2[%c0_2, %c0_3] : memref<128x128xbf16, #tpu.memory_space<vmem>>, vector<128x128xbf16>
    %c128_i32 = arith.constant 128 : i32
    %5 = arith.muli %arg1, %c128_i32 : i32
    %6 = tpu.assume_multiple %5, 128 : i32
    %7 = arith.index_cast %6 : i32 to index
    %c0_4 = arith.constant 0 : index
    %8 = vector.load %arg3[%7, %c0_4] : memref<128x128xbf16, #tpu.memory_space<vmem>>, vector<128x128xbf16>
    %cst = arith.constant dense<0.000000e+00> : vector<128x128xf32>
    %9 = tpu.matmul %4, %8, %cst {dimension_numbers = #tpu.dot_dimension_numbers<[1], [0], [0], [1], [0, 0, 1, 1], [], []>} : vector<128x128xbf16>, vector<128x128xbf16>, vector<128x128xf32> -> vector<128x128xf32>
    %10 = arith.addf %3, %9 : vector<128x128xf32>
    %c0_5 = arith.constant 0 : index
    %c0_6 = arith.constant 0 : index
    %11 = vector.load %arg6[%c0_5, %c0_6] : memref<128x128xf32, #tpu.memory_space<vmem>>, vector<128x128xf32>
    tpu.vector_store %arg6[%c0_5, %c0_6], %10 {strides = array<i32>} : memref<128x128xf32, #tpu.memory_space<vmem>>, vector<128x128xf32>,
    %c0_i32_7 = arith.constant 0 : i32
    %12 = arith.cmpi eq, %arg1, %c0_i32_7 : i32
    %13 = arith.extui %12 : i1 to i32
    %c0_i32_8 = arith.constant 0 : i32
    %14 = arith.cmpi ne, %13, %c0_i32_8 : i32
    scf.if %14 {
      %c0_9 = arith.constant 0 : index
      %c0_10 = arith.constant 0 : index
      %15 = vector.load %arg6[%c0_9, %c0_10] : memref<128x128xf32, #tpu.memory_space<vmem>>, vector<128x128xf32>
      %c0_11 = arith.constant 0 : index
      %c0_12 = arith.constant 0 : index
      %16 = vector.load %arg4[%c0_11, %c0_12] : memref<1x128xf32, #tpu.memory_space<vmem>>, vector<1x128xf32>
      %17 = vector.broadcast %16 : vector<1x128xf32> to vector<128x128xf32>
      %18 = arith.addf %15, %17 : vector<128x128xf32>
      %cst_13 = arith.constant 0.000000e+00 : f32
      %19 = vector.broadcast %cst_13 : f32 to vector<128x128xf32>
      %20 = arith.maximumf %18, %19 : vector<128x128xf32>
      %21 = arith.truncf %20 : vector<128x128xf32> to vector<128x128xbf16>
      %c0_14 = arith.constant 0 : index
      %c0_15 = arith.constant 0 : index
      %22 = vector.load %arg5[%c0_14, %c0_15] : memref<128x128xbf16, #tpu.memory_space<vmem>>, vector<128x128xbf16>
      tpu.vector_store %arg5[%c0_14, %c0_15], %21 {strides = array<i32>} : memref<128x128xbf16, #tpu.memory_space<vmem>>, vector<128x128xbf16>,
    } else {
    }
    return
  }
  func.func @transform_0(%arg0: i32, %arg1: i32) -> (i32, i32) {
    %c0_i32 = arith.constant 0 : i32
    return %arg0, %arg1 : i32, i32
  }
  func.func @transform_1(%arg0: i32, %arg1: i32) -> (i32, i32) {
    %c0_i32 = arith.constant 0 : i32
    %c0_i32_0 = arith.constant 0 : i32
    %c0_i32_1 = arith.constant 0 : i32
    return %c0_i32, %c0_i32_0 : i32, i32
  }
  func.func @transform_2(%arg0: i32, %arg1: i32) -> (i32, i32) {
    %c0_i32 = arith.constant 0 : i32
    %c0_i32_0 = arith.constant 0 : i32
    %c0_i32_1 = arith.constant 0 : i32
    return %c0_i32, %c0_i32_0 : i32, i32
  }
  func.func @transform_3(%arg0: i32, %arg1: i32) -> (i32, i32) {
    %c0_i32 = arith.constant 0 : i32
    %c0_i32_0 = arith.constant 0 : i32
    return %arg0, %c0_i32 : i32, i32
  }
}

module attributes {stable_mosaic.version = 11 : i64} {
  func.func @kernel(%arg0: i32, %arg1: i32, %arg2: memref<128x128xbf16, #tpu.memory_space<vmem>>, %arg3: memref<128x128xbf16, #tpu.memory_space<vmem>>, %arg4: memref<1x128xf32, #tpu.memory_space<vmem>>, %arg5: memref<128x128xf32, #tpu.memory_space<vmem>>) attributes {dimension_semantics = [#tpu.dimension_semantics<parallel>, #tpu.dimension_semantics<arbitrary>], iteration_bounds = array<i64: 1, 1>, scalar_prefetch = 0 : i64, scratch_operands = 0 : i64, tpu.core_type = #tpu.core_type<tc>, window_params = [{transform_indices = @transform_0, window_bounds = array<i64: 128, 128>}, {pipeline_mode = #tpu.pipeline_mode<synchronous>, transform_indices = @transform_1, window_bounds = array<i64: 128, 128>}, {pipeline_mode = #tpu.pipeline_mode<synchronous>, transform_indices = @transform_2, window_bounds = array<i64: 1, 128>}, {transform_indices = @transform_3, window_bounds = array<i64: 128, 128>}]} {
    %c0_i32 = arith.constant 0 : i32
    %0 = arith.cmpi eq, %arg1, %c0_i32 : i32
    %1 = arith.extui %0 : i1 to i32
    %c0_i32_0 = arith.constant 0 : i32
    %2 = arith.cmpi ne, %1, %c0_i32_0 : i32
    scf.if %2 {
      %cst_9 = arith.constant 0.000000e+00 : f32
      %15 = vector.broadcast %cst_9 : f32 to vector<128x128xf32>
      %c0_10 = arith.constant 0 : index
      %c0_11 = arith.constant 0 : index
      %16 = vector.load %arg5[%c0_10, %c0_11] : memref<128x128xf32, #tpu.memory_space<vmem>>, vector<128x128xf32>
      tpu.vector_store %arg5[%c0_10, %c0_11], %15 {strides = array<i32>} : memref<128x128xf32, #tpu.memory_space<vmem>>, vector<128x128xf32>,
    } else {
    }
    %c0 = arith.constant 0 : index
    %c0_1 = arith.constant 0 : index
    %3 = vector.load %arg5[%c0, %c0_1] : memref<128x128xf32, #tpu.memory_space<vmem>>, vector<128x128xf32>
    %c0_2 = arith.constant 0 : index
    %c0_3 = arith.constant 0 : index
    %4 = vector.load %arg2[%c0_2, %c0_3] : memref<128x128xbf16, #tpu.memory_space<vmem>>, vector<128x128xbf16>
    %c128_i32 = arith.constant 128 : i32
    %5 = arith.muli %arg1, %c128_i32 : i32
    %6 = tpu.assume_multiple %5, 128 : i32
    %7 = arith.index_cast %6 : i32 to index
    %c0_4 = arith.constant 0 : index
    %8 = vector.load %arg3[%7, %c0_4] : memref<128x128xbf16, #tpu.memory_space<vmem>>, vector<128x128xbf16>
    %cst = arith.constant dense<0.000000e+00> : vector<128x128xf32>
    %9 = tpu.matmul %4, %8, %cst {dimension_numbers = #tpu.dot_dimension_numbers<[1], [0], [0], [1], [0, 0, 1, 1], [], []>} : vector<128x128xbf16>, vector<128x128xbf16>, vector<128x128xf32> -> vector<128x128xf32>
    %10 = arith.addf %3, %9 : vector<128x128xf32>
    %c0_5 = arith.constant 0 : index
    %c0_6 = arith.constant 0 : index
    %11 = vector.load %arg5[%c0_5, %c0_6] : memref<128x128xf32, #tpu.memory_space<vmem>>, vector<128x128xf32>
    tpu.vector_store %arg5[%c0_5, %c0_6], %10 {strides = array<i32>} : memref<128x128xf32, #tpu.memory_space<vmem>>, vector<128x128xf32>,
    %c0_i32_7 = arith.constant 0 : i32
    %12 = arith.cmpi eq, %arg1, %c0_i32_7 : i32
    %13 = arith.extui %12 : i1 to i32
    %c0_i32_8 = arith.constant 0 : i32
    %14 = arith.cmpi ne, %13, %c0_i32_8 : i32
    scf.if %14 {
      %c0_9 = arith.constant 0 : index
      %c0_10 = arith.constant 0 : index
      %15 = vector.load %arg5[%c0_9, %c0_10] : memref<128x128xf32, #tpu.memory_space<vmem>>, vector<128x128xf32>
      %c0_11 = arith.constant 0 : index
      %c0_12 = arith.constant 0 : index
      %16 = vector.load %arg4[%c0_11, %c0_12] : memref<1x128xf32, #tpu.memory_space<vmem>>, vector<1x128xf32>
      %17 = vector.broadcast %16 : vector<1x128xf32> to vector<128x128xf32>
      %18 = arith.addf %15, %17 : vector<128x128xf32>
      %cst_13 = arith.constant 0.000000e+00 : f32
      %19 = vector.broadcast %cst_13 : f32 to vector<128x128xf32>
      %20 = arith.maximumf %18, %19 : vector<128x128xf32>
      %c0_14 = arith.constant 0 : index
      %c0_15 = arith.constant 0 : index
      %21 = vector.load %arg5[%c0_14, %c0_15] : memref<128x128xf32, #tpu.memory_space<vmem>>, vector<128x128xf32>
      tpu.vector_store %arg5[%c0_14, %c0_15], %20 {strides = array<i32>} : memref<128x128xf32, #tpu.memory_space<vmem>>, vector<128x128xf32>,
    } else {
    }
    return
  }
  func.func @transform_0(%arg0: i32, %arg1: i32) -> (i32, i32) {
    %c0_i32 = arith.constant 0 : i32
    return %arg0, %arg1 : i32, i32
  }
  func.func @transform_1(%arg0: i32, %arg1: i32) -> (i32, i32) {
    %c0_i32 = arith.constant 0 : i32
    %c0_i32_0 = arith.constant 0 : i32
    %c0_i32_1 = arith.constant 0 : i32
    return %c0_i32, %c0_i32_0 : i32, i32
  }
  func.func @transform_2(%arg0: i32, %arg1: i32) -> (i32, i32) {
    %c0_i32 = arith.constant 0 : i32
    %c0_i32_0 = arith.constant 0 : i32
    %c0_i32_1 = arith.constant 0 : i32
    return %c0_i32, %c0_i32_0 : i32, i32
  }
  func.func @transform_3(%arg0: i32, %arg1: i32) -> (i32, i32) {
    %c0_i32 = arith.constant 0 : i32
    %c0_i32_0 = arith.constant 0 : i32
    return %arg0, %c0_i32 : i32, i32
  }
}

</mosaic_0001>

<bundles_post_ra>
// kernel: forward.4
= control target key start
LH: loop header
LB: loop body
LE: loop exit
PB: predicated region body
PF: predicated region fallthrough
CT: control target
= control target key end

     0   :  { %s583_s1 = inlined_call_operand.vmem [shape: bf16[128,128], index: 1, kind: input, shape index: {}]   ;;  %s584_s0 = inlined_call_operand.vmem [shape: bf16[128,128], index: 0, kind: input, shape index: {}]   ;;  %s585_s2 = inlined_call_operand.vmem [shape: bf16[128,128], index: 2, kind: output, shape index: {}]  }
   0x1   :  { %v480_v0 = vld [vmem:[%s583_s1 + $0x38] sm:$0xff]   ;;  %v481_v1 = vld [vmem:[%s583_s1 + $0x30] sm:$0xff]   ;;  %v482_v2 = vld [vmem:[%s583_s1 + $0x28] sm:$0xff]  }
   0x2   :  { %432 = vmatprep.subr.bf16.mxu0 %v480_v0  ;;  %464 = vmatprep.subr.bf16.mxu1 %v480_v0  ;;  %v483_v3 = vld [vmem:[%s583_s1 + $0x20] sm:$0xff]   ;;  %v484_v6 = vld [vmem:[%s583_s1 + $0x18] sm:$0xff]   ;;  %v485_v7 = vld [vmem:[%s583_s1 + $0x10] sm:$0xff]  }
   0x3   :  { %433 = vmatpush3.bf16.msra.mxu0 %v480_v0  ;;  %472 = vmatpush3.bf16.msra.mxu1 %v480_v0  ;;  %v488_v4 = vld [vmem:[%s584_s0] sm:$0xff]   ;;  %v486_v8 = vld [vmem:[%s583_s1 + $0x8] sm:$0xff]   ;;  %v492_v12 = vld [vmem:[%s584_s0 + $0x10] sm:$0xff]  }
   0x4   :  { %434 = vmatprep.subr.bf16.mxu0 %v481_v1  ;;  %465 = vmatprep.subr.bf16.mxu1 %v481_v1  ;;  %v489_v5 = vld [vmem:[%s584_s0 + $0x20] sm:$0xff]   ;;  %v490_v10 = vld [vmem:[%s584_s0 + $0x8] sm:$0xff]   ;;  %v493_v13 = vld [vmem:[%s584_s0 + $0x30] sm:$0xff]  }
   0x5   :  { %448 = vmatprep.mubr.bf16.mxu0 %v488_v4  ;;  %456 = vmatprep.mubr.bf16.mxu1 %v489_v5  ;;  %v487_v9 = vld [vmem:[%s583_s1] sm:$0xff]   ;;  %v491_v11 = vld [vmem:[%s584_s0 + $0x28] sm:$0xff]   ;;  %v494_v14 = vld [vmem:[%s584_s0 + $0x18] sm:$0xff]  }
   0x6   :  { %v495_v15 = vld [vmem:[%s584_s0 + $0x38] sm:$0xff]  }
   0x7   :  { %435 = vmatpush3.bf16.msra.mxu0 %v481_v1  ;;  %473 = vmatpush3.bf16.msra.mxu1 %v481_v1 }
   0x8   :  { %436 = vmatprep.subr.bf16.mxu0 %v482_v2  ;;  %466 = vmatprep.subr.bf16.mxu1 %v482_v2 }
   0xb   :  { %437 = vmatpush3.bf16.msra.mxu0 %v482_v2  ;;  %474 = vmatpush3.bf16.msra.mxu1 %v482_v2 }
   0xc   :  { %438 = vmatprep.subr.bf16.mxu0 %v483_v3  ;;  %467 = vmatprep.subr.bf16.mxu1 %v483_v3 }
   0xf   :  { %439 = vmatpush3.bf16.msra.mxu0 %v483_v3  ;;  %475 = vmatpush3.bf16.msra.mxu1 %v483_v3 }
  0x10   :  { %440 = vmatprep.subr.bf16.mxu0 %v484_v6  ;;  %468 = vmatprep.subr.bf16.mxu1 %v484_v6 }
  0x13   :  { %441 = vmatpush3.bf16.msra.mxu0 %v484_v6  ;;  %476 = vmatpush3.bf16.msra.mxu1 %v484_v6 }
  0x14   :  { %442 = vmatprep.subr.bf16.mxu0 %v485_v7  ;;  %469 = vmatprep.subr.bf16.mxu1 %v485_v7 }
  0x17   :  { %443 = vmatpush3.bf16.msra.mxu0 %v485_v7  ;;  %477 = vmatpush3.bf16.msra.mxu1 %v485_v7 }
  0x18   :  { %444 = vmatprep.subr.bf16.mxu0 %v486_v8  ;;  %470 = vmatprep.subr.bf16.mxu1 %v486_v8 }
  0x1b   :  { %445 = vmatpush3.bf16.msra.mxu0 %v486_v8  ;;  %478 = vmatpush3.bf16.msra.mxu1 %v486_v8 }
  0x1c   :  { %446 = vmatprep.subr.bf16.mxu0 %v487_v9  ;;  %471 = vmatprep.subr.bf16.mxu1 %v487_v9 }
  0x1f   :  { %447 = vmatpush3.bf16.msra.mxu0 %v487_v9  ;;  %479 = vmatpush3.bf16.msra.mxu1 %v487_v9 }
  0x22   :  { %449 = vmatmul.mubr.bf16.vlgmr.msra.gmra.mxu0 %v490_v10  ;;  %457 = vmatmul.mubr.bf16.vlgmr.msra.gmra.mxu1 %v491_v11 }
  0x23   :  { %452 = vmatprep.mubr.bf16.mxu0 %v492_v12  ;;  %460 = vmatprep.mubr.bf16.mxu1 %v493_v13 }
  0x2a   :  { %453 = vmatmul.mubr.bf16.gmra.mxu0 %v494_v14  ;;  %461 = vmatmul.mubr.bf16.gmra.mxu1 %v495_v15 }
  0xe2   :  { %v450_v16 = vpop.f32.mrf.mxu0  ;;  %v458_v17 = vpop.f32.mrf.mxu1 }
  0xe4   :  { %v174_v18 = vpop.f32.mrf.mxu0  ;;  %v206_v19 = vpop.f32.mrf.mxu1 }
  0xe6   :  { %v451_v20 = vpop.f32.mrf.mxu0  ;;  %v459_v21 = vpop.f32.mrf.mxu1 }
  0xe7   :  { %v377_v22 = vpack.c.bf16 %v451_v20, %v450_v16  ;;  %v397_v23 = vpack.c.bf16 %v459_v21, %v458_v17 }
  0xe8   :  { %v177_v24 = vpop.f32.mrf.mxu0  ;;  %v209_v25 = vpop.f32.mrf.mxu1 }
  0xe9   :  { %409 = vst [vmem:[%s585_s2 + $0x8] sm:$0xff] %v377_v22   ;;  %413 = vst [vmem:[%s585_s2 + $0x28] sm:$0xff] %v397_v23   ;;  %v372_v26 = vpack.c.bf16 %v177_v24, %v174_v18  ;;  %v392_v27 = vpack.c.bf16 %v209_v25, %v206_v19 }
  0xea   :  { %v454_v28 = vpop.f32.mrf.mxu0  ;;  %v462_v29 = vpop.f32.mrf.mxu1 }
  0xeb   :  { %373 = vst [vmem:[%s585_s2] sm:$0xff] %v372_v26   ;;  %412 = vst [vmem:[%s585_s2 + $0x20] sm:$0xff] %v392_v27  }
  0xec   :  { %v190_v30 = vpop.f32.mrf.mxu0  ;;  %v222_v31 = vpop.f32.mrf.mxu1 }
  0xee   :  { %v455_v32 = vpop.f32.mrf.mxu0  ;;  %v463_v33 = vpop.f32.mrf.mxu1 }
  0xef   :  { %v387_v34 = vpack.c.bf16 %v455_v32, %v454_v28  ;;  %v407_v35 = vpack.c.bf16 %v463_v33, %v462_v29 }
  0xf0   :  { %v193_v36 = vpop.f32.mrf.mxu0  ;;  %v225_v37 = vpop.f32.mrf.mxu1 }
  0xf1   :  { %411 = vst [vmem:[%s585_s2 + $0x18] sm:$0xff] %v387_v34   ;;  %415 = vst [vmem:[%s585_s2 + $0x38] sm:$0xff] %v407_v35   ;;  %v382_v38 = vpack.c.bf16 %v193_v36, %v190_v30  ;;  %v402_v39 = vpack.c.bf16 %v225_v37, %v222_v31 }
  0xf3   :  { %410 = vst [vmem:[%s585_s2 + $0x10] sm:$0xff] %v382_v38   ;;  %414 = vst [vmem:[%s585_s2 + $0x30] sm:$0xff] %v402_v39  }

// kernel: forward.5
= control target key start
LH: loop header
LB: loop body
LE: loop exit
PB: predicated region body
PF: predicated region fallthrough
CT: control target
= control target key end

     0   :  { %s728_s1 = inlined_call_operand.vmem [shape: bf16[128,128], index: 1, kind: input, shape index: {}]   ;;  %s729_s0 = inlined_call_operand.vmem [shape: bf16[128,128], index: 0, kind: input, shape index: {}]   ;;  %s730_s2 = inlined_call_operand.vmem [shape: f32[1,128], index: 2, kind: input, shape index: {}]   ;;  %s731_s3 = inlined_call_operand.vmem [shape: bf16[128,128], index: 3, kind: output, shape index: {}]  }
   0x1   :  { %v617_v0 = vld [vmem:[%s728_s1 + $0x38] sm:$0xff]   ;;  %v618_v1 = vld [vmem:[%s728_s1 + $0x30] sm:$0xff]   ;;  %v619_v2 = vld [vmem:[%s728_s1 + $0x28] sm:$0xff]  }
   0x2   :  { %569 = vmatprep.subr.bf16.mxu0 %v617_v0  ;;  %601 = vmatprep.subr.bf16.mxu1 %v617_v0  ;;  %v620_v3 = vld [vmem:[%s728_s1 + $0x20] sm:$0xff]   ;;  %v621_v6 = vld [vmem:[%s728_s1 + $0x18] sm:$0xff]   ;;  %v622_v7 = vld [vmem:[%s728_s1 + $0x10] sm:$0xff]  }
   0x3   :  { %570 = vmatpush3.bf16.msra.mxu0 %v617_v0  ;;  %609 = vmatpush3.bf16.msra.mxu1 %v617_v0  ;;  %v625_v4 = vld [vmem:[%s729_s0] sm:$0xff]   ;;  %v623_v8 = vld [vmem:[%s728_s1 + $0x8] sm:$0xff]   ;;  %v629_v12 = vld [vmem:[%s729_s0 + $0x10] sm:$0xff]  }
   0x4   :  { %571 = vmatprep.subr.bf16.mxu0 %v618_v1  ;;  %602 = vmatprep.subr.bf16.mxu1 %v618_v1  ;;  %v626_v5 = vld [vmem:[%s729_s0 + $0x20] sm:$0xff]   ;;  %v627_v10 = vld [vmem:[%s729_s0 + $0x8] sm:$0xff]   ;;  %v630_v13 = vld [vmem:[%s729_s0 + $0x30] sm:$0xff]  }
   0x5   :  { %585 = vmatprep.mubr.bf16.mxu0 %v625_v4  ;;  %593 = vmatprep.mubr.bf16.mxu1 %v626_v5  ;;  %v624_v9 = vld [vmem:[%s728_s1] sm:$0xff]   ;;  %v628_v11 = vld [vmem:[%s729_s0 + $0x28] sm:$0xff]   ;;  %v631_v14 = vld [vmem:[%s729_s0 + $0x18] sm:$0xff]  }
   0x6   :  { %v632_v15 = vld [vmem:[%s729_s0 + $0x38] sm:$0xff]   ;;  %v473_v16 = vld [vmem:[%s730_s2] ss:$0 sm:$0xff] }
   0x7   :  { %572 = vmatpush3.bf16.msra.mxu0 %v618_v1  ;;  %610 = vmatpush3.bf16.msra.mxu1 %v618_v1 }
   0x8   :  { %573 = vmatprep.subr.bf16.mxu0 %v619_v2  ;;  %603 = vmatprep.subr.bf16.mxu1 %v619_v2 }
   0xb   :  { %574 = vmatpush3.bf16.msra.mxu0 %v619_v2  ;;  %611 = vmatpush3.bf16.msra.mxu1 %v619_v2 }
   0xc   :  { %575 = vmatprep.subr.bf16.mxu0 %v620_v3  ;;  %604 = vmatprep.subr.bf16.mxu1 %v620_v3 }
   0xf   :  { %576 = vmatpush3.bf16.msra.mxu0 %v620_v3  ;;  %612 = vmatpush3.bf16.msra.mxu1 %v620_v3 }
  0x10   :  { %577 = vmatprep.subr.bf16.mxu0 %v621_v6  ;;  %605 = vmatprep.subr.bf16.mxu1 %v621_v6 }
  0x13   :  { %578 = vmatpush3.bf16.msra.mxu0 %v621_v6  ;;  %613 = vmatpush3.bf16.msra.mxu1 %v621_v6 }
  0x14   :  { %579 = vmatprep.subr.bf16.mxu0 %v622_v7  ;;  %606 = vmatprep.subr.bf16.mxu1 %v622_v7 }
  0x17   :  { %580 = vmatpush3.bf16.msra.mxu0 %v622_v7  ;;  %614 = vmatpush3.bf16.msra.mxu1 %v622_v7 }
  0x18   :  { %581 = vmatprep.subr.bf16.mxu0 %v623_v8  ;;  %607 = vmatprep.subr.bf16.mxu1 %v623_v8 }
  0x1b   :  { %582 = vmatpush3.bf16.msra.mxu0 %v623_v8  ;;  %615 = vmatpush3.bf16.msra.mxu1 %v623_v8 }
  0x1c   :  { %583 = vmatprep.subr.bf16.mxu0 %v624_v9  ;;  %608 = vmatprep.subr.bf16.mxu1 %v624_v9 }
  0x1f   :  { %584 = vmatpush3.bf16.msra.mxu0 %v624_v9  ;;  %616 = vmatpush3.bf16.msra.mxu1 %v624_v9 }
  0x22   :  { %586 = vmatmul.mubr.bf16.vlgmr.msra.gmra.mxu0 %v627_v10  ;;  %594 = vmatmul.mubr.bf16.vlgmr.msra.gmra.mxu1 %v628_v11 }
  0x23   :  { %589 = vmatprep.mubr.bf16.mxu0 %v629_v12  ;;  %597 = vmatprep.mubr.bf16.mxu1 %v630_v13 }
  0x2a   :  { %590 = vmatmul.mubr.bf16.gmra.mxu0 %v631_v14  ;;  %598 = vmatmul.mubr.bf16.gmra.mxu1 %v632_v15 }
  0xe2   :  { %v587_v17 = vpop.f32.mrf.mxu0  ;;  %v595_v18 = vpop.f32.mrf.mxu1 }
  0xe3   :  { %v341_v19 = vadd.f32 %v587_v17, %v473_v16  ;;  %v349_v20 = vadd.f32 %v595_v18, %v473_v16 }
  0xe4   :  { %v218_v21 = vpop.f32.mrf.mxu0  ;;  %v250_v22 = vpop.f32.mrf.mxu1 }
  0xe5   :  { %v339_v23 = vadd.f32 %v473_v16, %v218_v21  ;;  %v347_v24 = vadd.f32 %v473_v16, %v250_v22  ;;  %v357_v29 = vmax.f32 %v341_v19, 0.0  ;;  %v365_v30 = vmax.f32 %v349_v20, 0.0 }
  0xe6   :  { %v588_v25 = vpop.f32.mrf.mxu0  ;;  %v596_v26 = vpop.f32.mrf.mxu1 }
  0xe7   :  { %v342_v27 = vadd.f32 %v588_v25, %v473_v16  ;;  %v350_v28 = vadd.f32 %v596_v26, %v473_v16  ;;  %v355_v37 = vmax.f32 %v339_v23, 0.0  ;;  %v363_v38 = vmax.f32 %v347_v24, 0.0 }
  0xe8   :  { %v221_v31 = vpop.f32.mrf.mxu0  ;;  %v253_v32 = vpop.f32.mrf.mxu1 }
  0xe9   :  { %v358_v33 = vmax.f32 %v342_v27, 0.0  ;;  %v366_v34 = vmax.f32 %v350_v28, 0.0  ;;  %v340_v35 = vadd.f32 %v473_v16, %v221_v31  ;;  %v348_v36 = vadd.f32 %v473_v16, %v253_v32 }
  0xea   :  { %v591_v39 = vpop.f32.mrf.mxu0  ;;  %v599_v40 = vpop.f32.mrf.mxu1 }
  0xeb   :  { %v514_v41 = vpack.c.bf16 %v358_v33, %v357_v29  ;;  %v534_v42 = vpack.c.bf16 %v366_v34, %v365_v30  ;;  %v356_v43 = vmax.f32 %v340_v35, 0.0  ;;  %v364_v44 = vmax.f32 %v348_v36, 0.0 }
  0xec   :  { %v345_v45 = vadd.f32 %v591_v39, %v473_v16  ;;  %v353_v46 = vadd.f32 %v599_v40, %v473_v16  ;;  %v234_v47 = vpop.f32.mrf.mxu0  ;;  %v266_v48 = vpop.f32.mrf.mxu1 }
  0xed   :  { %546 = vst [vmem:[%s731_s3 + $0x8] sm:$0xff] %v514_v41   ;;  %550 = vst [vmem:[%s731_s3 + $0x28] sm:$0xff] %v534_v42   ;;  %v509_v49 = vpack.c.bf16 %v356_v43, %v355_v37  ;;  %v529_v50 = vpack.c.bf16 %v364_v44, %v363_v38  ;;  %v343_v51 = vadd.f32 %v473_v16, %v234_v47 }
  0xee   :  { %v351_v52 = vadd.f32 %v473_v16, %v266_v48  ;;  %v592_v53 = vpop.f32.mrf.mxu0  ;;  %v600_v54 = vpop.f32.mrf.mxu1  ;;  %v361_v57 = vmax.f32 %v345_v45, 0.0  ;;  %v369_v58 = vmax.f32 %v353_v46, 0.0 }
  0xef   :  { %510 = vst [vmem:[%s731_s3] sm:$0xff] %v509_v49   ;;  %549 = vst [vmem:[%s731_s3 + $0x20] sm:$0xff] %v529_v50   ;;  %v346_v55 = vadd.f32 %v592_v53, %v473_v16  ;;  %v354_v56 = vadd.f32 %v600_v54, %v473_v16  ;;  %v359_v1 = vmax.f32 %v343_v51, 0.0 }
  0xf0   :  { %v237_v59 = vpop.f32.mrf.mxu0  ;;  %v269_v60 = vpop.f32.mrf.mxu1  ;;  %v367_v2 = vmax.f32 %v351_v52, 0.0 }
  0xf1   :  { %v362_v61 = vmax.f32 %v346_v55, 0.0  ;;  %v370_v62 = vmax.f32 %v354_v56, 0.0  ;;  %v344_v63 = vadd.f32 %v473_v16, %v237_v59  ;;  %v352_v0 = vadd.f32 %v473_v16, %v269_v60 }
  0xf3   :  { %v524_v3 = vpack.c.bf16 %v362_v61, %v361_v57  ;;  %v544_v4 = vpack.c.bf16 %v370_v62, %v369_v58  ;;  %v360_v5 = vmax.f32 %v344_v63, 0.0  ;;  %v368_v6 = vmax.f32 %v352_v0, 0.0 }
  0xf5   :  { %548 = vst [vmem:[%s731_s3 + $0x18] sm:$0xff] %v524_v3   ;;  %552 = vst [vmem:[%s731_s3 + $0x38] sm:$0xff] %v544_v4   ;;  %v519_v7 = vpack.c.bf16 %v360_v5, %v359_v1  ;;  %v539_v8 = vpack.c.bf16 %v368_v6, %v367_v2 }
  0xf7   :  { %547 = vst [vmem:[%s731_s3 + $0x10] sm:$0xff] %v519_v7   ;;  %551 = vst [vmem:[%s731_s3 + $0x30] sm:$0xff] %v539_v8  }

// kernel: forward.7
= control target key start
LH: loop header
LB: loop body
LE: loop exit
PB: predicated region body
PF: predicated region fallthrough
CT: control target
= control target key end

     0   :  { %s610_s1 = inlined_call_operand.vmem [shape: bf16[128,128], index: 1, kind: input, shape index: {}]   ;;  %s611_s0 = inlined_call_operand.vmem [shape: bf16[128,128], index: 0, kind: input, shape index: {}]   ;;  %s612_s2 = inlined_call_operand.vmem [shape: f32[1,128], index: 2, kind: input, shape index: {}]   ;;  %s613_s3 = inlined_call_operand.vmem [shape: f32[128,128], index: 3, kind: output, shape index: {}]  }
   0x1   :  { %v475_v0 = vld [vmem:[%s610_s1 + $0x38] sm:$0xff]   ;;  %v476_v1 = vld [vmem:[%s610_s1 + $0x30] sm:$0xff]   ;;  %v477_v2 = vld [vmem:[%s610_s1 + $0x28] sm:$0xff]  }
   0x2   :  { %426 = vmatprep.subr.bf16.mxu0 %v475_v0  ;;  %458 = vmatprep.subr.bf16.mxu1 %v475_v0  ;;  %v478_v3 = vld [vmem:[%s610_s1 + $0x20] sm:$0xff]   ;;  %v479_v6 = vld [vmem:[%s610_s1 + $0x18] sm:$0xff]   ;;  %v480_v7 = vld [vmem:[%s610_s1 + $0x10] sm:$0xff]  }
   0x3   :  { %427 = vmatpush3.bf16.msra.mxu0 %v475_v0  ;;  %466 = vmatpush3.bf16.msra.mxu1 %v475_v0  ;;  %v483_v4 = vld [vmem:[%s611_s0] sm:$0xff]   ;;  %v481_v8 = vld [vmem:[%s610_s1 + $0x8] sm:$0xff]   ;;  %v487_v12 = vld [vmem:[%s611_s0 + $0x10] sm:$0xff]  }
   0x4   :  { %428 = vmatprep.subr.bf16.mxu0 %v476_v1  ;;  %459 = vmatprep.subr.bf16.mxu1 %v476_v1  ;;  %v484_v5 = vld [vmem:[%s611_s0 + $0x20] sm:$0xff]   ;;  %v485_v10 = vld [vmem:[%s611_s0 + $0x8] sm:$0xff]   ;;  %v488_v13 = vld [vmem:[%s611_s0 + $0x30] sm:$0xff]  }
   0x5   :  { %442 = vmatprep.mubr.bf16.mxu0 %v483_v4  ;;  %450 = vmatprep.mubr.bf16.mxu1 %v484_v5  ;;  %v482_v9 = vld [vmem:[%s610_s1] sm:$0xff]   ;;  %v486_v11 = vld [vmem:[%s611_s0 + $0x28] sm:$0xff]   ;;  %v489_v14 = vld [vmem:[%s611_s0 + $0x18] sm:$0xff]  }
   0x6   :  { %v490_v15 = vld [vmem:[%s611_s0 + $0x38] sm:$0xff]   ;;  %v409_v17 = vld [vmem:[%s612_s2] ss:$0 sm:$0xff] }
   0x7   :  { %429 = vmatpush3.bf16.msra.mxu0 %v476_v1  ;;  %467 = vmatpush3.bf16.msra.mxu1 %v476_v1 }
   0x8   :  { %430 = vmatprep.subr.bf16.mxu0 %v477_v2  ;;  %460 = vmatprep.subr.bf16.mxu1 %v477_v2 }
   0xb   :  { %431 = vmatpush3.bf16.msra.mxu0 %v477_v2  ;;  %468 = vmatpush3.bf16.msra.mxu1 %v477_v2 }
   0xc   :  { %432 = vmatprep.subr.bf16.mxu0 %v478_v3  ;;  %461 = vmatprep.subr.bf16.mxu1 %v478_v3 }
   0xf   :  { %433 = vmatpush3.bf16.msra.mxu0 %v478_v3  ;;  %469 = vmatpush3.bf16.msra.mxu1 %v478_v3 }
  0x10   :  { %434 = vmatprep.subr.bf16.mxu0 %v479_v6  ;;  %462 = vmatprep.subr.bf16.mxu1 %v479_v6 }
  0x13   :  { %435 = vmatpush3.bf16.msra.mxu0 %v479_v6  ;;  %470 = vmatpush3.bf16.msra.mxu1 %v479_v6 }
  0x14   :  { %436 = vmatprep.subr.bf16.mxu0 %v480_v7  ;;  %463 = vmatprep.subr.bf16.mxu1 %v480_v7 }
  0x17   :  { %437 = vmatpush3.bf16.msra.mxu0 %v480_v7  ;;  %471 = vmatpush3.bf16.msra.mxu1 %v480_v7 }
  0x18   :  { %438 = vmatprep.subr.bf16.mxu0 %v481_v8  ;;  %464 = vmatprep.subr.bf16.mxu1 %v481_v8 }
  0x1b   :  { %439 = vmatpush3.bf16.msra.mxu0 %v481_v8  ;;  %472 = vmatpush3.bf16.msra.mxu1 %v481_v8 }
  0x1c   :  { %440 = vmatprep.subr.bf16.mxu0 %v482_v9  ;;  %465 = vmatprep.subr.bf16.mxu1 %v482_v9 }
  0x1f   :  { %441 = vmatpush3.bf16.msra.mxu0 %v482_v9  ;;  %473 = vmatpush3.bf16.msra.mxu1 %v482_v9 }
  0x22   :  { %443 = vmatmul.mubr.bf16.vlgmr.msra.gmra.mxu0 %v485_v10  ;;  %451 = vmatmul.mubr.bf16.vlgmr.msra.gmra.mxu1 %v486_v11 }
  0x23   :  { %446 = vmatprep.mubr.bf16.mxu0 %v487_v12  ;;  %454 = vmatprep.mubr.bf16.mxu1 %v488_v13 }
  0x2a   :  { %447 = vmatmul.mubr.bf16.gmra.mxu0 %v489_v14  ;;  %455 = vmatmul.mubr.bf16.gmra.mxu1 %v490_v15 }
  0xe2   :  { %v444_v16 = vpop.f32.mrf.mxu0  ;;  %v452_v18 = vpop.f32.mrf.mxu1 }
  0xe3   :  { %v341_v21 = vadd.f32 %v444_v16, %v409_v17  ;;  %v349_v22 = vadd.f32 %v452_v18, %v409_v17 }
  0xe4   :  { %v218_v19 = vpop.f32.mrf.mxu0  ;;  %v250_v20 = vpop.f32.mrf.mxu1 }
  0xe5   :  { %v357_v25 = vmax.f32 %v341_v21, 0.0  ;;  %v365_v26 = vmax.f32 %v349_v22, 0.0  ;;  %v339_v27 = vadd.f32 %v409_v17, %v218_v19  ;;  %v347_v28 = vadd.f32 %v409_v17, %v250_v20 }
  0xe6   :  { %v445_v23 = vpop.f32.mrf.mxu0  ;;  %v453_v24 = vpop.f32.mrf.mxu1 }
  0xe7   :  { %373 = vst [vmem:[%s613_s3 + $0x10] sm:$0xff] %v357_v25  ;;  %381 = vst [vmem:[%s613_s3 + $0x50] sm:$0xff] %v365_v26  ;;  %v355_v31 = vmax.f32 %v339_v27, 0.0  ;;  %v363_v32 = vmax.f32 %v347_v28, 0.0  ;;  %v342_v33 = vadd.f32 %v445_v23, %v409_v17  ;;  %v350_v34 = vadd.f32 %v453_v24, %v409_v17 }
  0xe8   :  { %v221_v29 = vpop.f32.mrf.mxu0  ;;  %v253_v30 = vpop.f32.mrf.mxu1 }
  0xe9   :  { %371 = vst [vmem:[%s613_s3] sm:$0xff] %v355_v31  ;;  %379 = vst [vmem:[%s613_s3 + $0x40] sm:$0xff] %v363_v32  ;;  %v340_v37 = vadd.f32 %v409_v17, %v221_v29  ;;  %v348_v38 = vadd.f32 %v409_v17, %v253_v30  ;;  %v358_v39 = vmax.f32 %v342_v33, 0.0  ;;  %v366_v40 = vmax.f32 %v350_v34, 0.0 }
  0xea   :  { %v448_v35 = vpop.f32.mrf.mxu0  ;;  %v456_v36 = vpop.f32.mrf.mxu1 }
  0xeb   :  { %v356_v43 = vmax.f32 %v340_v37, 0.0  ;;  %v364_v44 = vmax.f32 %v348_v38, 0.0  ;;  %v345_v45 = vadd.f32 %v448_v35, %v409_v17  ;;  %v353_v46 = vadd.f32 %v456_v36, %v409_v17  ;;  %374 = vst [vmem:[%s613_s3 + $0x18] sm:$0xff] %v358_v39  ;;  %382 = vst [vmem:[%s613_s3 + $0x58] sm:$0xff] %v366_v40 }
  0xec   :  { %v234_v41 = vpop.f32.mrf.mxu0  ;;  %v266_v42 = vpop.f32.mrf.mxu1 }
  0xed   :  { %372 = vst [vmem:[%s613_s3 + $0x8] sm:$0xff] %v356_v43  ;;  %380 = vst [vmem:[%s613_s3 + $0x48] sm:$0xff] %v364_v44  ;;  %v361_v49 = vmax.f32 %v345_v45, 0.0  ;;  %v369_v50 = vmax.f32 %v353_v46, 0.0  ;;  %v343_v51 = vadd.f32 %v409_v17, %v234_v41  ;;  %v351_v52 = vadd.f32 %v409_v17, %v266_v42 }
  0xee   :  { %v449_v47 = vpop.f32.mrf.mxu0  ;;  %v457_v48 = vpop.f32.mrf.mxu1 }
  0xef   :  { %377 = vst [vmem:[%s613_s3 + $0x30] sm:$0xff] %v361_v49  ;;  %385 = vst [vmem:[%s613_s3 + $0x70] sm:$0xff] %v369_v50  ;;  %v346_v55 = vadd.f32 %v449_v47, %v409_v17  ;;  %v354_v56 = vadd.f32 %v457_v48, %v409_v17  ;;  %v359_v57 = vmax.f32 %v343_v51, 0.0  ;;  %v367_v58 = vmax.f32 %v351_v52, 0.0 }
  0xf0   :  { %v237_v53 = vpop.f32.mrf.mxu0  ;;  %v269_v54 = vpop.f32.mrf.mxu1 }
  0xf1   :  { %v362_v59 = vmax.f32 %v346_v55, 0.0  ;;  %v370_v60 = vmax.f32 %v354_v56, 0.0  ;;  %v344_v61 = vadd.f32 %v409_v17, %v237_v53  ;;  %v352_v62 = vadd.f32 %v409_v17, %v269_v54  ;;  %375 = vst [vmem:[%s613_s3 + $0x20] sm:$0xff] %v359_v57  ;;  %383 = vst [vmem:[%s613_s3 + $0x60] sm:$0xff] %v367_v58 }
  0xf3   :  { %378 = vst [vmem:[%s613_s3 + $0x38] sm:$0xff] %v362_v59  ;;  %386 = vst [vmem:[%s613_s3 + $0x78] sm:$0xff] %v370_v60  ;;  %v360_v63 = vmax.f32 %v344_v61, 0.0  ;;  %v368_v0 = vmax.f32 %v352_v62, 0.0 }
  0xf5   :  { %376 = vst [vmem:[%s613_s3 + $0x28] sm:$0xff] %v360_v63  ;;  %384 = vst [vmem:[%s613_s3 + $0x68] sm:$0xff] %v368_v0 }

</bundles_post_ra>
